<compile_context>
chip_gen: v7x
topology: tpu7x:2x2x1
jax: 0.10.0
libtpu: 0.0.40
codegen_flags: <defaults>
</compile_context>

<pallas_src>
import functools

import jax
import jax.numpy as jnp
from jax.experimental import pallas as pl
from jax.experimental.pallas import tpu as pltpu


def _round_up(x, m):
    return ((x + m - 1) // m) * m


def _proj_kernel(p_ref, w_ref, b_ref, o_ref):
    """One (M-tile, N-tile) block of  out = patches @ weight + bias.

    The ragged last M block computes on garbage rows, but rows are independent
    in the GEMM and Pallas masks their stores, so this is safe.  Do NOT turn
    the out_spec into an accumulator that would read those rows back.
    """
    acc = jnp.dot(p_ref[...], w_ref[...], preferred_element_type=jnp.float32)
    o_ref[...] = (acc + b_ref[...]).astype(o_ref.dtype)


def prepare_proj_params(weight, bias, *, compute_dtype=jnp.bfloat16):
    """One-time (outside jit) prep of the Conv2d parameters.

    weight: (embed_dim, C, ph, pw)  -- PyTorch Conv2d layout
    bias:   (embed_dim,)
    Returns:
      w_kn : (K, embed_dim) = weight.reshape(embed_dim, K).T in compute_dtype
      b_row: (1, embed_dim) float32
    The patch-matrix column order is (c, ph, pw) with c major, identical to the
    flattened Conv2d weight, so no extra permutation is needed.
    """
    embed_dim = int(weight.shape[0])
    k = int(weight.shape[1] * weight.shape[2] * weight.shape[3])
    w_kn = jnp.transpose(weight.reshape(embed_dim, k), (1, 0)).astype(compute_dtype)
    b_row = bias.reshape(1, embed_dim).astype(jnp.float32)
    return w_kn, b_row


def _extract_patches(x, patch_size, stride, compute_dtype):
    """(B, C, H, W) -> ((B*h*w, C*ph*pw) patch matrix, h, w); columns (c, ph, pw)."""
    B, C, H, W = x.shape
    ph, pw = patch_size
    sh, sw = stride
    h = (H - ph) // sh + 1
    w = (W - pw) // sw + 1
    xc = x.astype(compute_dtype)
    if (sh, sw) == (ph, pw):
        # Non-overlapping (standard AudioMAE config): the unfold is a pure
        # reshape/transpose -- no conv FLOPs, no redundant data.
        xc = xc[:, :, : h * ph, : w * pw]                  # drop remainder (usually a no-op)
        xc = xc.reshape(B, C, h, ph, w, pw)
        patches = jnp.transpose(xc, (0, 2, 4, 1, 3, 5))    # (B, h, w, C, ph, pw)
    else:
        # Overlapping stride: dilated-patches conv; feature dim is channel-major
        # (c, ph, pw), matching the flattened Conv2d weight exactly.
        patches = jax.lax.conv_general_dilated_patches(
            xc,
            filter_shape=patch_size,
            window_strides=stride,
            padding="VALID",
            dimension_numbers=("NCHW", "OIHW", "NHWC"),
        )                                                   # (B, h, w, C*ph*pw)
    return patches.reshape(B * h * w, C * ph * pw), h, w


@functools.partial(jax.jit, static_argnames=("patch_size", "stride", "out_dtype"))
def patch_embed_forward(x, w_kn, b_row, *, patch_size, stride, out_dtype=jnp.bfloat16):
    """Pallas implementation of PatchEmbed_new.forward.

    x:     (B, C, H, W) float32
    w_kn:  (K, embed_dim) prepared weight (see prepare_proj_params)
    b_row: (1, embed_dim) float32 prepared bias
    returns (B, num_patches, embed_dim) in out_dtype (bf16 by default).
    """
    B, C, H, W = x.shape
    K, N = w_kn.shape

    patches, h, w = _extract_patches(x, patch_size, stride, w_kn.dtype)
    M = B * h * w

    in_sz = jnp.dtype(w_kn.dtype).itemsize
    out_sz = jnp.dtype(out_dtype).itemsize

    # --- N axis: single full-extent block up to 2048 so the weight/bias are
    # resident and DMA'd once; only very large embed dims are tiled.
    TN = N if N <= 2048 else 2048

    # --- M axis: as large as the VMEM budget allows, multiple of 16 (bf16 packing).
    TM = min(1024, _round_up(M, 16))

    def working_set(tm, tn):
        # double-buffered patches + weight + bias + output tiles
        return 2 * (tm * K * in_sz + K * tn * in_sz + tn * 4 + tm * tn * out_sz)

    while working_set(TM, TN) > 24 * 2**20 and TM > 128:
        TM = max(128, TM // 2)

    # v7x has 2 TensorCores sharing the "parallel" grid axes: never leave one idle.
    if pl.cdiv(M, TM) * pl.cdiv(N, TN) == 1 and M >= 32:
        TM = _round_up(pl.cdiv(M, 2), 16)

    grid = (pl.cdiv(M, TM), pl.cdiv(N, TN))

    cost = pl.CostEstimate(
        flops=2 * M * K * N,
        transcendentals=0,
        bytes_accessed=M * K * in_sz + K * N * in_sz + N * 4 + M * N * out_sz,
    )

    out = pl.pallas_call(
        _proj_kernel,
        out_shape=jax.ShapeDtypeStruct((M, N), out_dtype),
        grid_spec=pltpu.PrefetchScalarGridSpec(
            num_scalar_prefetch=0,
            grid=grid,
            in_specs=[
                pl.BlockSpec((TM, K), lambda i, j: (i, 0)),   # patch tile
                pl.BlockSpec((K, TN), lambda i, j: (0, j)),   # weight (resident per j)
                pl.BlockSpec((1, TN), lambda i, j: (0, j)),   # bias row
            ],
            out_specs=pl.BlockSpec((TM, TN), lambda i, j: (i, j)),
        ),
        compiler_params=pltpu.CompilerParams(
            dimension_semantics=("parallel", "parallel"),
            vmem_limit_bytes=int(
                min(max(2 * working_set(TM, TN), 32 * 2**20), 64 * 2**20)
            ),
        ),
        cost_estimate=cost,
    )(patches, w_kn, b_row)

    # (M, N) -> (B, num_patches, embed_dim)  == proj(x).flatten(2).transpose(1, 2)
    return out.reshape(B, h * w, N)


def _reference(x, weight, bias, patch_size, stride):
    """Pure-JAX f32 reference: Conv2d -> flatten(2) -> transpose(1, 2)."""
    y = jax.lax.conv_general_dilated(
        x, weight, window_strides=stride, padding="VALID",
        dimension_numbers=("NCHW", "OIHW", "NCHW"),
        precision=jax.lax.Precision.HIGHEST,
    )
    y = y + bias[None, :, None, None]
    B, N, h, w = y.shape
    return jnp.transpose(y.reshape(B, N, h * w), (0, 2, 1))


def _run_case(key, *, B, C, H, W, patch_size, stride, embed_dim):
    kx, kw, kb = jax.random.split(key, 3)
    x = jax.random.normal(kx, (B, C, H, W), jnp.float32)
    weight = jax.random.normal(kw, (embed_dim, C, *patch_size), jnp.float32) * 0.05
    bias = jax.random.normal(kb, (embed_dim,), jnp.float32) * 0.05

    # One-time weight prep (outside the jitted hot path).
    w_kn, b_row = prepare_proj_params(weight, bias, compute_dtype=jnp.bfloat16)

    out = patch_embed_forward(x, w_kn, b_row, patch_size=patch_size, stride=stride)
    out = jax.block_until_ready(out)

    ref = _reference(x, weight, bias, patch_size, stride)
    h = (H - patch_size[0]) // stride[0] + 1
    w = (W - patch_size[1]) // stride[1] + 1
    assert out.shape == (B, h * w, embed_dim), out.shape
    out_f32 = out.astype(jnp.float32)
    err = float(jnp.max(jnp.abs(out_f32 - ref)))
    # bf16 input/weight streams and bf16 output vs. an f32 reference.
    assert jnp.allclose(out_f32, ref, atol=4e-2, rtol=4e-2), err


if __name__ == "__main__":
    key = jax.random.PRNGKey(0)
    k1, k2 = jax.random.split(key)
    # AudioMAE-style config: in_chans=1, stride == patch_size (fused-reshape im2col path).
    _run_case(k1, B=2, C=1, H=16, W=16, patch_size=(4, 4), stride=(4, 4), embed_dim=32)
    # Overlapping-stride config (module-default style): dilated-patches im2col path.
    _run_case(k2, B=2, C=3, H=16, W=16, patch_size=(4, 4), stride=(2, 2), embed_dim=32)
    print("KERNEL_OK")
</pallas_src>

<mosaic_0001>
module attributes {stable_mosaic.version = 11 : i64} {
  func.func @_proj_kernel(%arg0: i32, %arg1: i32, %arg2: memref<16x16xbf16, #tpu.memory_space<vmem>>, %arg3: memref<16x32xbf16, #tpu.memory_space<vmem>>, %arg4: memref<1x32xf32, #tpu.memory_space<vmem>>, %arg5: memref<16x32xbf16, #tpu.memory_space<vmem>>) attributes {dimension_semantics = [#tpu.dimension_semantics<parallel>, #tpu.dimension_semantics<parallel>], iteration_bounds = array<i64: 2, 1>, scalar_prefetch = 0 : i64, scratch_operands = 0 : i64, tpu.core_type = #tpu.core_type<tc>, window_params = [{transform_indices = @transform_0, window_bounds = array<i64: 16, 16>}, {transform_indices = @transform_1, window_bounds = array<i64: 16, 32>}, {transform_indices = @transform_2, window_bounds = array<i64: 1, 32>}, {transform_indices = @transform_3, window_bounds = array<i64: 16, 32>}]} {
    %c0 = arith.constant 0 : index
    %c0_0 = arith.constant 0 : index
    %0 = vector.load %arg2[%c0, %c0_0] : memref<16x16xbf16, #tpu.memory_space<vmem>>, vector<16x16xbf16>
    %c0_1 = arith.constant 0 : index
    %c0_2 = arith.constant 0 : index
    %1 = vector.load %arg3[%c0_1, %c0_2] : memref<16x32xbf16, #tpu.memory_space<vmem>>, vector<16x32xbf16>
    %cst = arith.constant dense<0.000000e+00> : vector<16x32xf32>
    %2 = tpu.matmul %0, %1, %cst {dimension_numbers = #tpu.dot_dimension_numbers<[1], [0], [0], [1], [0, 0, 1, 1], [], []>} : vector<16x16xbf16>, vector<16x32xbf16>, vector<16x32xf32> -> vector<16x32xf32>
    %c0_3 = arith.constant 0 : index
    %c0_4 = arith.constant 0 : index
    %3 = vector.load %arg4[%c0_3, %c0_4] : memref<1x32xf32, #tpu.memory_space<vmem>>, vector<1x32xf32>
    %4 = vector.broadcast %3 : vector<1x32xf32> to vector<16x32xf32>
    %5 = arith.addf %2, %4 : vector<16x32xf32>
    %6 = arith.truncf %5 : vector<16x32xf32> to vector<16x32xbf16>
    %c0_5 = arith.constant 0 : index
    %c0_6 = arith.constant 0 : index
    %7 = vector.load %arg5[%c0_5, %c0_6] : memref<16x32xbf16, #tpu.memory_space<vmem>>, vector<16x32xbf16>
    tpu.vector_store %arg5[%c0_5, %c0_6], %6 {strides = array<i32>} : memref<16x32xbf16, #tpu.memory_space<vmem>>, vector<16x32xbf16>,
    return
  }
  func.func @transform_0(%arg0: i32, %arg1: i32) -> (i32, i32) {
    %c0_i32 = arith.constant 0 : i32
    %c0_i32_0 = arith.constant 0 : i32
    return %arg0, %c0_i32 : i32, i32
  }
  func.func @transform_1(%arg0: i32, %arg1: i32) -> (i32, i32) {
    %c0_i32 = arith.constant 0 : i32
    %c0_i32_0 = arith.constant 0 : i32
    return %c0_i32, %arg1 : i32, i32
  }
  func.func @transform_2(%arg0: i32, %arg1: i32) -> (i32, i32) {
    %c0_i32 = arith.constant 0 : i32
    %c0_i32_0 = arith.constant 0 : i32
    return %c0_i32, %arg1 : i32, i32
  }
  func.func @transform_3(%arg0: i32, %arg1: i32) -> (i32, i32) {
    %c0_i32 = arith.constant 0 : i32
    return %arg0, %arg1 : i32, i32
  }
}

</mosaic_0001>

<bundles_post_ra>
// kernel: patch_embed_forward.1
= control target key start
LH: loop header
LB: loop body
LE: loop exit
PB: predicated region body
PF: predicated region fallthrough
CT: control target
= control target key end

     0   :  { %8 = vsyncpa [#allocation3], 0  ;;  %s728_s0 = inlined_call_operand.vmem [shape: bf16[32,16], index: 0, kind: input, shape index: {}]   ;;  %s729_s1 = inlined_call_operand.vmem [shape: bf16[16,32], index: 1, kind: input, shape index: {}]   ;;  %s730_s2 = inlined_call_operand.vmem [shape: f32[1,32], index: 2, kind: input, shape index: {}]   ;;  %s731_s3 = inlined_call_operand.hbm [shape: bf16[32,32], index: 3, kind: output, shape index: {}]  }
   0x1   :  { %10 = vsyncpa [#allocation3 + $0x1], 0  ;;  %s608_s12 = smov 0   ;;  %s610_s13 = smov 0  }
   0x2   :  { %s612_s14 = smov 0   ;;  %s614_s15 = smov 0  }
   0x3   :  { %s616_s16 = smov 0   ;;  %s618_s17 = smov 0  }
   0x4 LB: > { %s410_s18 = sadd.s32 4294967295, %s581_s17   ;;  %s411_s19 = sadd.s32 4294967294, %s581_s17   ;;  %s581_s17 = sphi %s618_s17, %s16_s17   ;;  %s577_s16 = sphi %s616_s16, %s738_s16   ;;  %s573_s15 = sphi %s614_s15, %s737_s15   ;;  %s569_s14 = sphi %s612_s14, %s736_s14   ;;  %s565_s13 = sphi %s610_s13, %s735_s13   ;;  %s561_s12 = sphi %s608_s12, %s734_s12  }
   0x5   : > { %s28_s20 = sadd.s32 1, %s577_s16  ;;  %s115_s21 = sadd.s32 1, %s569_s14 }
   0x6   : > { %p30_p0 = scmp.ge.s32.totalorder %s28_s20, 2  ;;  %p125_p1 = scmp.ne.s32.totalorder %s569_s14, %s565_s13 }
   0x7   : > { %p126_p2 = scmp.eq.s32.totalorder %s410_s18, 1  ;;  %p131_p3 = scmp.ne.s32.totalorder %s565_s13, %s561_s12 }
   0x8   : > { %s740_s20 = smov (%p30_p0, %s28_s20), 0  ;;  %p132_p5 = scmp.eq.s32.totalorder %s411_s19, 1 }
   0x9   : > { %p648_p4 = por %p126_p2, %p125_p1  ;;  %s110_s23 = ssub.s32 %s577_s16, %s740_s20 }
   0xa   : > { %p416_p6 = scmp.ge.s32.totalorder %s581_s17, 1  ;;  %p113_p7 = scmp.eq.s32.totalorder %s110_s23, 0 }
   0xb   : > { %p655_p8 = por %p132_p5, %p131_p3  ;;  %p172_p9 = scmp.lt.s32.totalorder %s581_s17, 3 }
   0xc   : > { %s661_s25 = scalar_select %p113_p7, %s569_s14, %s115_s21  }
   0xd   : > { %p173_p10 = pnand %p416_p6, %p172_p9 }
   0xe   : > { %v501_v0 = vld [vmem:[%s729_s1] sm:$0xff] (!%p173_p10)   ;;  %v583_v1 = vmov (!%p173_p10), 0.0   ;;  %s418_s28 = sshll.u32 (!%p173_p10), %s573_s15, 1  ;;  %vm584_vm0 = vmmov (!%p173_p10), 0   ;;  %vm240_vm1 = vcmask (!%p173_p10), 130048   ;;  %s200_s6 = sand.u32 (!%p173_p10), 1, %s565_s13  }
   0xf   : > { %176 = sbr.rel (%p173_p10) target bundleno = 259 (0x103), region = 32  ;;  %436 = vmatprep.subr.bf16.mxu0 (!%p173_p10), %v583_v1  ;;  %438 = vmatprep.mubr.msk.bf16.mxu0 (!%p173_p10), %vm584_vm0, %v583_v1  ;;  %p204_p11 = scmp.lt.s32.totalorder (!%p173_p10), %s418_s28, 3  ;;  %v420_v3 = vld [vmem:[%s730_s2] ss:$0 sm:$0xff] (!%p173_p10)  ;;  %vm293_vm2 = vcmask (!%p173_p10), 257024  }
  0x10   : > { %437 = vmatpush3.bf16.msra.mxu0 (!%p173_p10), %v501_v0  ;;  %s417_s7 = sshll.u32 (!%p173_p10), %s200_s6, 3  ;;  %s433_s18 = sshll.u32 (!%p173_p10), %s573_s15, 7 }
  0x11   : > { %s202_s10 = scalar_lea.vmem (!%p173_p10), [#allocation2], %s417_s7  ;;  %s680_s23 = scalar_lea.hbm (!%p173_p10), %s731_s3, %s433_s18 }
  0x12   : > { %s311_s11 = sshll.u32 (!%p173_p10), %s202_s10, 4  ;;  %s682_s26 = scalar_lea.sflag (!%p173_p10), [#allocation3], %s200_s6  ;;  %s675_s11 = int_to_ptr.vmem [resolvable:$true] %s311_s11 }
  0x13   : > { %s503_s15 = scalar_lea.vmem (!%p173_p10), %s675_s11, 128  ;;  %s585_s27 = smov (!%p173_p10), [#allocation2]  }
  0x14   : > { %p504_p12 = scmp.ne.s32.totalorder (!%p173_p10), %s675_s11, %s503_s15 }
  0x16   : > { %s742_s28 = smov (!%p204_p11, %s418_s28), 3  ;;  %p505_p13 = pnand %p504_p12, %p648_p4 }
  0x17   : > { %s419_s29 = sshll.u32 %s742_s28, 2  ;;  %s507_s28 = sshll.u32 %s585_s27, 4  ;;  %s508_s28 = int_to_ptr.vmem [resolvable:$false] %s507_s28 }
  0x18   : > { %s207_s5 = scalar_lea.vmem %s728_s0, %s419_s29  ;;  %p506_p0 = pneg %p505_p13 }
  0x19   : > { %v502_v2 = vld [vmem:[%s207_s5] sm:$0xff]   ;;  %s509_s29 = scalar_lea.vmem %s508_s28, 256  ;;  %p510_p1 = scmp.lt.s32.totalorder %s675_s11, %s508_s28 }
  0x1a   : > { %439 = vmatmul.mubr.msk.bf16.vlgmr.msra.gmra.mrb[0].mxu0 %vm240_vm1, %v502_v2  ;;  %p511_p2 = scmp.lt.s32.totalorder %s509_s29, %s503_s15 }
  0x1c   : > { %p512_p3 = por %p511_p2, %p510_p1 }
  0x1e   : > { %p513_p5 = pnand %p512_p3, %p506_p0 }
  0xed   : > { %v278_v4 = vpop.f32.mrb[0].mxu0 }
  0xee   : > { %v279_v5 = vadd.f32 %v420_v3, %v278_v4  ;;  %v440_v6 = vpop.f32.mrb[1].mxu0 }
  0xef   : > { %v281_v7 = vpop.f32.mrb[2].mxu0 }
  0xf0   : > { %v431_v8 = vpack.c.bf16 %v279_v5, %v279_v5  ;;  %v282_v9 = vadd.f32 %v420_v3, %v281_v7  ;;  %v441_v10 = vpop.f32.mrb[3].mxu0 }
  0xf2   : > { %294 = vst.msk [vmem:[%s202_s10] sm:$0xf] %vm293_vm2, %v431_v8  ;;  %v432_v11 = vpack.c.bf16 %v282_v9, %v282_v9 }
  0xf4   : > { %295 = vst.msk [vmem:[%s202_s10 + $0x4] sm:$0xf] %vm293_vm2, %v432_v11 }
  0xf5   : > { %516 = shalt.err (!%p513_p5)
}
  0xf6   : > { %s517_s30 = scalar_lea.hbm %s680_s23, 128  ;;  %s521_s6 = scalar_lea.hbm %s731_s3, 256 }
  0xf7   : > { %p518_p6 = scmp.ne.s32.totalorder %s680_s23, %s517_s30  ;;  %p522_p10 = scmp.lt.u32.totalorder %s680_s23, %s731_s3 }
  0xf8   : > { %p523_p11 = scmp.lt.u32.totalorder %s521_s6, %s517_s30  ;;  %p525_p13 = scmp.lt.u32.totalorder %s517_s30, %s680_s23 }
  0xf9   : > { %p519_p7 = pnand %p518_p6, %p648_p4 }
  0xfa   : > { %p524_p12 = por %p523_p11, %p522_p10 }
  0xfb   : > { %p520_p9 = pneg %p519_p7 }
  0xfc   : > { %p526_p0 = por %p525_p13, %p524_p12 }
  0xfe   : > { %p527_p1 = pnand %p526_p0, %p520_p9 }
 0x100   : > { %530 = shalt.err (!%p527_p1)
}
 0x101   : > { %s586_s9 = smov 64   ;;  %s587_s10 = smov 4  }
 0x102   : > { %442 = dma.vmem_to_hbm [thread:$0]  (%p648_p4), %s675_s11, 128, %s680_s23, %s682_s26, %s586_s9, %s586_s9, %s587_s10  }
 0x103 PF: > { %p448_p2 = scmp.ge.s32.totalorder %s581_s17, 2  ;;  %s326_s18 = sand.u32 1, %s561_s12  }
 0x104   : > { %s327_s19 = scalar_lea.sflag [#allocation3], %s326_s18 }
 0x105   : > { %p445_p3 = pnand %p448_p2, %p655_p8 }
 0x107   : > { %556 = dma.done.wait (!%p445_p3), %s327_s19, 128  }
 0x108   : > { %558 = vsyncadd (!%p445_p3), %s327_s19, 4294967168  ;;  %s16_s17 = sadd.s32 1, %s581_s17   ;;  %s734_s12 = smov %s565_s13 }
 0x109   : > { %p13_p5 = scmp.ge.s32.totalorder %s16_s17, 4   ;;  %s735_s13 = smov %s569_s14 }
 0x10a   : > { %s736_s14 = smov %s661_s25  ;;  %s737_s15 = smov %s577_s16 }
 0x10b   : > { %s738_s16 = smov %s740_s20  ;;  %15 = sbr.rel (!%p13_p5) target bundleno = 4 (0x4), region = 73 }
 0x112   :  { %332 = vsyncpa [#allocation3], 1 }
 0x113   :  { %334 = vsyncpa [#allocation3 + $0x1], 1 }

</bundles_post_ra>
